<compile_context>
chip_gen: v7x
topology: tpu7x:2x2x1
jax: 0.10.0
libtpu: 0.0.40
codegen_flags: <defaults>
</compile_context>

<pallas_src>
import functools

import jax
import jax.numpy as jnp
from jax.experimental import pallas as pl
from jax.experimental.pallas import tpu as pltpu


def _round_up(n, m):
    return ((n + m - 1) // m) * m


def deepq_kernel(x_ref, p_ref, o_ref, *,
                 S, H, A, R_W1, R_B1, R_W2, R_B2, act_dtype):
    """One batch tile, batch-on-lanes layout.

    x_ref : (S, tb)  input states, batch on lanes (lane-dense).
    p_ref : packed params, every piece starting on an 8-row boundary:
              rows [R_W1, R_W1+H) cols [0,S) : W1^T  (H, S)
              rows [R_B1, R_B1+H) col  0     : b1    (H, 1)
              rows [R_W2, R_W2+A) cols [0,H) : W2^T  (A, H)
              rows [R_B2, R_B2+A) col  0     : b2    (A, 1)
    o_ref : (A, tb)  sigmoid(W2^T tanh(W1^T x + b1) + b2), lane-dense store.
    """
    x = x_ref[...]                              # (S, tb)

    w1t = p_ref[R_W1:R_W1 + H, :S]              # (H, S)
    b1 = p_ref[R_B1:R_B1 + H, 0:1]              # (H, 1)
    w2t = p_ref[R_W2:R_W2 + A, :H]              # (A, H)
    b2 = p_ref[R_B2:R_B2 + A, 0:1]              # (A, 1)

    # fc1: (H,S)@(S,tb) -> (H,tb); N = tb fully occupies the lane dimension.
    h = jnp.dot(w1t, x, preferred_element_type=jnp.float32) + b1
    h = jnp.tanh(h.astype(act_dtype)).astype(jnp.float32)

    # fc2: (A,H)@(H,tb) -> (A,tb)
    y = jnp.dot(w2t, h, preferred_element_type=jnp.float32) + b2

    # sigmoid via tanh identity: one EUP tanh + one VPU FMA, no f32 divide.
    s = jnp.tanh((0.5 * y).astype(act_dtype)).astype(jnp.float32)
    o_ref[...] = (0.5 * (s + 1.0)).astype(o_ref.dtype)


def pack_params(w1, b1, w2, b2):
    """Pack transposed weights/biases into ONE sublane-aligned f32 buffer.

    w1: (S, H)  [in, out],  b1: (1, H) or (H,)
    w2: (H, A)  [in, out],  b2: (1, A) or (A,)

    Every piece starts on a row offset that is a multiple of 8 (sublane-tile
    aligned) so in-kernel static slices are zero-cost views.  Buffer is one
    lane-tile (128 columns) wide.  Done once, host-side.
    """
    S, H = w1.shape
    A = w2.shape[1]
    C = 128
    r_w1 = 0
    r_b1 = _round_up(r_w1 + H, 8)
    r_w2 = _round_up(r_b1 + H, 8)
    r_b2 = _round_up(r_w2 + A, 8)
    P = _round_up(r_b2 + A, 8)

    buf = jnp.zeros((P, C), jnp.float32)
    buf = buf.at[r_w1:r_w1 + H, :S].set(w1.T)                       # W1^T
    buf = buf.at[r_b1:r_b1 + H, 0:1].set(jnp.reshape(b1, (H, 1)))   # b1
    buf = buf.at[r_w2:r_w2 + A, :H].set(w2.T)                       # W2^T
    buf = buf.at[r_b2:r_b2 + A, 0:1].set(jnp.reshape(b2, (A, 1)))   # b2
    layout = dict(S=S, H=H, A=A, R_W1=r_w1, R_B1=r_b1, R_W2=r_w2, R_B2=r_b2)
    return buf, layout


def deepq_forward_t(xT, packed_params, layout, *, tb=32768,
                    act_dtype=jnp.float32):
    """Transposed-layout forward: xT (S, B) -> (A, B), batch on lanes."""
    S, A = layout["S"], layout["A"]
    assert xT.shape[0] == S
    B = xT.shape[1]

    if B < 2048:
        # Single block: lane dim == full array dim (always a legal block),
        # one pipeline step, everything VMEM-resident.
        tb_eff = B
    else:
        # >= 4 grid steps (>= 2 per TensorCore on v7x) but never bigger than
        # `tb` lanes per tile; tiles stay a multiple of 128 lanes.
        tb_eff = max(128, min(tb, _round_up(pl.cdiv(B, 4), 128)))
    grid = (pl.cdiv(B, tb_eff),)

    kernel = functools.partial(deepq_kernel, act_dtype=act_dtype, **layout)
    return pl.pallas_call(
        kernel,
        out_shape=jax.ShapeDtypeStruct((A, B), jnp.float32),
        grid=grid,
        in_specs=[
            pl.BlockSpec((S, tb_eff), lambda i: (0, i)),
            # Packed params: whole (tiny) buffer, same block every step.
            pl.BlockSpec(packed_params.shape, lambda i: (0, 0)),
        ],
        out_specs=pl.BlockSpec((A, tb_eff), lambda i: (0, i)),
        compiler_params=pltpu.CompilerParams(
            dimension_semantics=("parallel",)),
    )(xT, packed_params)


def deepq_forward(x, packed_params, layout, *, tb=32768,
                  act_dtype=jnp.float32, min_pallas_batch=128):
    """Batch-major API: x (B, S) -> (B, A), matching the PyTorch module."""
    S, H, A = layout["S"], layout["H"], layout["A"]
    B = x.shape[0]

    if B < min_pallas_batch:
        # Acting path (B = 1-2): a pallas_call on ~32 bytes of input is pure
        # dispatch + DMA-descriptor overhead; plain XLA is strictly better.
        w1t = packed_params[layout["R_W1"]:layout["R_W1"] + H, :S]   # (H, S)
        b1 = packed_params[layout["R_B1"]:layout["R_B1"] + H, 0]     # (H,)
        w2t = packed_params[layout["R_W2"]:layout["R_W2"] + A, :H]   # (A, H)
        b2 = packed_params[layout["R_B2"]:layout["R_B2"] + A, 0]     # (A,)
        h = jnp.tanh(x @ w1t.T + b1)
        return jax.nn.sigmoid(h @ w2t.T + b2)

    # One transpose on each side of the kernel (layout plumbing, not compute);
    # upstream code that already produces (S, B) can call deepq_forward_t.
    yT = deepq_forward_t(x.T, packed_params, layout, tb=tb,
                         act_dtype=act_dtype)
    return yT.T


def init_params(key, num_states, num_actions, num_hidden):
    """Deterministic init mimicking torch.nn.Linear's U(-1/sqrt(fan_in), +)."""
    k1, k2, k3, k4 = jax.random.split(key, 4)
    bound1 = 1.0 / jnp.sqrt(jnp.float32(num_states))
    bound2 = 1.0 / jnp.sqrt(jnp.float32(num_hidden))
    # Stored as (in, out) so reference does x @ W (PyTorch stores (out, in)).
    w1 = jax.random.uniform(k1, (num_states, num_hidden), jnp.float32, -bound1, bound1)
    b1 = jax.random.uniform(k2, (1, num_hidden), jnp.float32, -bound1, bound1)
    w2 = jax.random.uniform(k3, (num_hidden, num_actions), jnp.float32, -bound2, bound2)
    b2 = jax.random.uniform(k4, (1, num_actions), jnp.float32, -bound2, bound2)
    return w1, b1, w2, b2


def reference_forward(x, w1, b1, w2, b2):
    h = jnp.tanh(x @ w1 + b1)
    return jax.nn.sigmoid(h @ w2 + b2)


# TODO(synk): select_action (epsilon-greedy host RNG) and optimize
# (smooth_l1 + RMSprop backward/step) are acting/training logic with no clean
# single-kernel Pallas equivalent; only the forward pass is implemented here.

if __name__ == "__main__":
    # CartPole-v0: num_states = 4, num_actions = 2, num_hidden = 16.
    num_states, num_actions, num_hidden = 4, 2, 16

    key = jax.random.PRNGKey(0)
    k_p, k_x1, k_x2, k_x3 = jax.random.split(key, 4)
    w1, b1, w2, b2 = init_params(k_p, num_states, num_actions, num_hidden)
    params, layout = pack_params(w1, b1, w2, b2)

    # 1) Acting path (B = 2): plain-XLA fallback (no kernel dispatch).
    x_small = jax.random.normal(k_x1, (2, num_states), jnp.float32)
    out_s = jax.block_until_ready(deepq_forward(x_small, params, layout))
    ref_s = reference_forward(x_small, w1, b1, w2, b2)
    assert out_s.shape == (2, num_actions)
    assert jnp.allclose(out_s, ref_s, atol=1e-5, rtol=1e-5)

    # 2) Single-block Pallas path (lane dim == batch, not a multiple of 128).
    x_mid = jax.random.normal(k_x2, (1000, num_states), jnp.float32)
    out_m = jax.block_until_ready(deepq_forward(x_mid, params, layout))
    ref_m = reference_forward(x_mid, w1, b1, w2, b2)
    assert out_m.shape == (1000, num_actions)
    assert jnp.allclose(out_m, ref_m, atol=1e-5, rtol=1e-5)

    # 3) Gridded Pallas path (4 parallel steps, batch on lanes).
    x_big = jax.random.normal(k_x3, (4096, num_states), jnp.float32)
    out_b = jax.block_until_ready(deepq_forward(x_big, params, layout))
    ref_b = reference_forward(x_big, w1, b1, w2, b2)
    assert out_b.shape == (4096, num_actions)
    assert jnp.allclose(out_b, ref_b, atol=1e-5, rtol=1e-5)

    print("KERNEL_OK")
</pallas_src>

<mosaic_0001>
module attributes {stable_mosaic.version = 11 : i64} {
  func.func @deepq_kernel(%arg0: i32, %arg1: memref<4x1000xf32, #tpu.memory_space<vmem>>, %arg2: memref<48x128xf32, #tpu.memory_space<vmem>>, %arg3: memref<2x1000xf32, #tpu.memory_space<vmem>>) attributes {dimension_semantics = [#tpu.dimension_semantics<parallel>], iteration_bounds = array<i64: 1>, scalar_prefetch = 0 : i64, scratch_operands = 0 : i64, tpu.core_type = #tpu.core_type<tc>, window_params = [{transform_indices = @transform_0, window_bounds = array<i64: 4, 1000>}, {pipeline_mode = #tpu.pipeline_mode<synchronous>, transform_indices = @transform_1, window_bounds = array<i64: 48, 128>}, {transform_indices = @transform_2, window_bounds = array<i64: 2, 1000>}]} {
    %c0 = arith.constant 0 : index
    %c0_0 = arith.constant 0 : index
    %0 = vector.load %arg1[%c0, %c0_0] : memref<4x1000xf32, #tpu.memory_space<vmem>>, vector<4x1000xf32>
    %c0_1 = arith.constant 0 : index
    %c0_2 = arith.constant 0 : index
    %1 = vector.load %arg2[%c0_1, %c0_2] : memref<48x128xf32, #tpu.memory_space<vmem>>, vector<16x4xf32>
    %c16 = arith.constant 16 : index
    %c0_3 = arith.constant 0 : index
    %2 = vector.load %arg2[%c16, %c0_3] : memref<48x128xf32, #tpu.memory_space<vmem>>, vector<16x1xf32>
    %c32 = arith.constant 32 : index
    %c0_4 = arith.constant 0 : index
    %3 = vector.load %arg2[%c32, %c0_4] : memref<48x128xf32, #tpu.memory_space<vmem>>, vector<2x16xf32>
    %c40 = arith.constant 40 : index
    %c0_5 = arith.constant 0 : index
    %4 = vector.load %arg2[%c40, %c0_5] : memref<48x128xf32, #tpu.memory_space<vmem>>, vector<2x1xf32>
    %cst = arith.constant dense<0.000000e+00> : vector<16x1000xf32>
    %5 = tpu.matmul %1, %0, %cst {dimension_numbers = #tpu.dot_dimension_numbers<[1], [0], [0], [1], [0, 0, 1, 1], [], []>} : vector<16x4xf32>, vector<4x1000xf32>, vector<16x1000xf32> -> vector<16x1000xf32>
    %6 = vector.broadcast %2 : vector<16x1xf32> to vector<16x1000xf32>
    %7 = arith.addf %5, %6 : vector<16x1000xf32>
    %8 = math.tanh %7 : vector<16x1000xf32>
    %cst_6 = arith.constant dense<0.000000e+00> : vector<2x1000xf32>
    %9 = tpu.matmul %3, %8, %cst_6 {dimension_numbers = #tpu.dot_dimension_numbers<[1], [0], [0], [1], [0, 0, 1, 1], [], []>} : vector<2x16xf32>, vector<16x1000xf32>, vector<2x1000xf32> -> vector<2x1000xf32>
    %10 = vector.broadcast %4 : vector<2x1xf32> to vector<2x1000xf32>
    %11 = arith.addf %9, %10 : vector<2x1000xf32>
    %cst_7 = arith.constant 5.000000e-01 : f32
    %12 = vector.broadcast %cst_7 : f32 to vector<2x1000xf32>
    %13 = arith.mulf %12, %11 : vector<2x1000xf32>
    %14 = math.tanh %13 : vector<2x1000xf32>
    %cst_8 = arith.constant 1.000000e+00 : f32
    %15 = vector.broadcast %cst_8 : f32 to vector<2x1000xf32>
    %16 = arith.addf %14, %15 : vector<2x1000xf32>
    %cst_9 = arith.constant 5.000000e-01 : f32
    %17 = vector.broadcast %cst_9 : f32 to vector<2x1000xf32>
    %18 = arith.mulf %17, %16 : vector<2x1000xf32>
    %c0_10 = arith.constant 0 : index
    %c0_11 = arith.constant 0 : index
    %19 = vector.load %arg3[%c0_10, %c0_11] : memref<2x1000xf32, #tpu.memory_space<vmem>>, vector<2x1000xf32>
    tpu.vector_store %arg3[%c0_10, %c0_11], %18 {strides = array<i32>} : memref<2x1000xf32, #tpu.memory_space<vmem>>, vector<2x1000xf32>,
    return
  }
  func.func @transform_0(%arg0: i32) -> (i32, i32) {
    %c0_i32 = arith.constant 0 : i32
    %c0_i32_0 = arith.constant 0 : i32
    return %c0_i32, %arg0 : i32, i32
  }
  func.func @transform_1(%arg0: i32) -> (i32, i32) {
    %c0_i32 = arith.constant 0 : i32
    %c0_i32_0 = arith.constant 0 : i32
    %c0_i32_1 = arith.constant 0 : i32
    return %c0_i32, %c0_i32_0 : i32, i32
  }
  func.func @transform_2(%arg0: i32) -> (i32, i32) {
    %c0_i32 = arith.constant 0 : i32
    %c0_i32_0 = arith.constant 0 : i32
    return %c0_i32, %arg0 : i32, i32
  }
}

</mosaic_0001>

<bundles_post_ra>
// kernel: tpu_custom_call.1
= control target key start
LH: loop header
LB: loop body
LE: loop exit
PB: predicated region body
PF: predicated region fallthrough
CT: control target
= control target key end

     0   :  { %7 = vsyncpa [#allocation3], 0  ;;  %s1076_s0 = inlined_call_operand.hbm [shape: f32[4,1000], index: 0, kind: input, shape index: {}]   ;;  %s1077_s1 = inlined_call_operand.hbm [shape: f32[48,128], index: 1, kind: input, shape index: {}]   ;;  %s1078_s2 = inlined_call_operand.hbm [shape: f32[2,1000], index: 2, kind: output, shape index: {}]  }
   0x1   :  { %8 = vsyncpa [#allocation6], 0 }
   0x2   :  { %9 = vsyncpa [#allocation4], 0  ;;  %s978_s9 = smov [#allocation2]   ;;  %s979_s11 = smov [#allocation5]  }
   0x3   :  { %s16_s10 = sshll.u32 %s978_s9, 4  ;;  %s25_s12 = sshll.u32 %s979_s11, 4  ;;  %s17_s10 = int_to_ptr.vmem [resolvable:$true] %s16_s10  ;;  %s1001_s12 = int_to_ptr.vmem [resolvable:$true] %s25_s12 }
   0x4   :  { %s906_s15 = scalar_lea.hbm %s1076_s0, 512 }
   0x5   :  { %p907_p0 = scmp.ne.s32.totalorder %s1076_s0, %s906_s15  ;;  %p910_p1 = scmp.lt.u32.totalorder %s906_s15, %s1076_s0 }
   0x7   :  { %p912_p2 = pnand %p910_p1, %p907_p0 }
   0x9   :  { %915 = shalt.err (!%p912_p2)
}
   0xa   :  { %s916_s20 = scalar_lea.vmem %s17_s10, 512  ;;  %p921_p4 = scmp.lt.s32.totalorder %s17_s10, %s17_s10 }
   0xb   :  { %p917_p3 = scmp.ne.s32.totalorder %s17_s10, %s916_s20  ;;  %p922_p5 = scmp.lt.s32.totalorder %s916_s20, %s916_s20 }
   0xd   :  { %p923_p6 = por %p922_p5, %p921_p4 }
   0xf   :  { %p924_p7 = pnand %p923_p6, %p917_p3 }
  0x11   :  { %927 = shalt.err (!%p924_p7)
}
  0x12   :  { %19 = dma.hbm_to_vmem [thread:$0]  %s1076_s0, 512, %s17_s10, [#allocation3]  }
  0x13   :  { %s928_s25 = scalar_lea.hbm %s1077_s1, 768 }
  0x14   :  { %p929_p8 = scmp.ne.s32.totalorder %s1077_s1, %s928_s25  ;;  %p932_p9 = scmp.lt.u32.totalorder %s928_s25, %s1077_s1 }
  0x16   :  { %p934_p10 = pnand %p932_p9, %p929_p8 }
  0x18   :  { %937 = shalt.err (!%p934_p10)
}
  0x19   :  { %s938_s30 = scalar_lea.vmem %s1001_s12, 768  ;;  %p943_p12 = scmp.lt.s32.totalorder %s1001_s12, %s1001_s12 }
  0x1a   :  { %p939_p11 = scmp.ne.s32.totalorder %s1001_s12, %s938_s30  ;;  %p944_p13 = scmp.lt.s32.totalorder %s938_s30, %s938_s30 }
  0x1c   :  { %p945_p0 = por %p944_p13, %p943_p12 }
  0x1e   :  { %p946_p1 = pnand %p945_p0, %p939_p11 }
  0x20   :  { %949 = shalt.err (!%p946_p1)
}
  0x21   :  { %s980_s0 = smov 128   ;;  %s981_s3 = smov 8  }
  0x22   :  { %31 = dma.hbm_to_vmem [thread:$0]  %s1077_s1, 768, %s1001_s12, [#allocation6], %s980_s0, %s980_s0, %s981_s3  }
  0x23   :  { %972 = dma.done.wait [#allocation3], 512  }
  0x24   :  { %973 = vsyncadd [#allocation3], 4294966784 }
  0x25   :  { %974 = dma.done.wait [#allocation6], 768  }
  0x26   :  { %975 = vsyncadd [#allocation6], 4294966528  ;;  %v982_v0 = vmov 0.0   ;;  %v983_v1 = vmov 0   ;;  %v38_v2 = vld [vmem:[#allocation2] sm:$0xff]  ;;  %vm73_vm0 = vcmask 1043456  }
  0x27   :  { %154 = vmatprep.mubr.f32.mxu0 %v982_v0  ;;  %231 = vmatprep.mubr.f32.mxu1 %v982_v0  ;;  %v39_v3 = vld [vmem:[#allocation2 + $0x8] sm:$0xff]  ;;  %v62_v4 = vcombine.high %v38_v2, %v38_v2  ;;  %v40_v6 = vld [vmem:[#allocation2 + $0x10] sm:$0xff]  ;;  %v41_v7 = vld [vmem:[#allocation2 + $0x18] sm:$0xff]  ;;  %vm66_vm1 = vcmask 31744   ;;  %vm419_vm2 = vcmask 130048   ;;  %vm784_vm3 = vcmask 1041408  }
  0x28   :  { %852 = vset.pattern.permute.xlu0 %v983_v1  ;;  %853 = vset.pattern.permute.xlu1 %v983_v1  ;;  %v63_v5 = vcombine.high %v39_v3, %v39_v3  ;;  %v42_v8 = vld [vmem:[#allocation5] sm:$0xff]  ;;  %v64_v9 = vcombine.high %v40_v6, %v40_v6  ;;  %v65_v10 = vcombine.high %v41_v7, %v41_v7  ;;  %v43_v11 = vld [vmem:[#allocation5 + $0x8] sm:$0xff]  ;;  %v44_v12 = vld [vmem:[#allocation5 + $0x10] sm:$0xff]  ;;  %vm785_vm4 = vcmask 1043458   ;;  %s985_s1 = smov [#allocation7]  }
  0x29   :  { %808 = vmatprep.subr.msk.mxu0 %vm73_vm0, %v62_v4  ;;  %50 = vperm.xlu0 %852, %v44_v12   ;;  %v45_v13 = vld [vmem:[#allocation5 + $0x18] sm:$0xff]  ;;  %v47_v14 = vld [vmem:[#allocation5 + $0x28] sm:$0x3]  ;;  %v46_v1 = vld [vmem:[#allocation5 + $0x20] sm:$0x3]  ;;  %vm787_vm6 = vcmask 1045508  }
  0x2a   :  { %812 = vmatprep.subr.msk.mxu1 %vm73_vm0, %v63_v5  ;;  %809 = vmatpush1.msk.msra.mxu0 %vm73_vm0, %v38_v2  ;;  %vm786_vm5 = vmor %vm785_vm4, %vm784_vm3  ;;  %vm789_vm8 = vcmask 850950   ;;  %s798_s6 = sshll.u32 %s985_s1, 4  ;;  %s799_s6 = int_to_ptr.vmem [resolvable:$true] %s798_s6 }
  0x2b   :  { %813 = vmatpush1.msk.msra.mxu1 %vm73_vm0, %v39_v3  ;;  %810 = vmatmul.mubr.msk.f32.vlgmr.msra.gmra.mrb[0].mxu0 %vm66_vm1, %v42_v8  ;;  %vm788_vm7 = vmor %vm787_vm6, %vm786_vm5  ;;  %s950_s7 = scalar_lea.vmem %s799_s6, 256  ;;  %p955_p3 = scmp.lt.s32.totalorder %s799_s6, %s799_s6 }
  0x2c   :  { %814 = vmatmul.mubr.msk.f32.vlgmr.msra.gmra.mrb[0].mxu1 %vm66_vm1, %v42_v8  ;;  %816 = vmatprep.subr.msk.mxu0 %vm73_vm0, %v64_v9  ;;  %vm790_vm9 = vmor %vm789_vm8, %vm788_vm7  ;;  %p951_p2 = scmp.ne.s32.totalorder %s799_s6, %s950_s7  ;;  %p956_p4 = scmp.lt.s32.totalorder %s950_s7, %s950_s7 }
  0x2d   :  { %820 = vmatprep.subr.msk.mxu1 %vm73_vm0, %v65_v10  ;;  %817 = vmatpush1.msk.msra.mxu0 %vm73_vm0, %v40_v6 }
  0x2e   :  { %821 = vmatpush1.msk.msra.mxu1 %vm73_vm0, %v41_v7  ;;  %160 = vmatprep.mubr.f32.mxu0 %v982_v0  ;;  %p957_p5 = por %p956_p4, %p955_p3 }
  0x2f   :  { %237 = vmatprep.mubr.f32.mxu1 %v982_v0  ;;  %811 = vmatmul.mubr.msk.f32.gmra.mrb[2].mxu0 %vm66_vm1, %v43_v11 }
  0x30   :  { %815 = vmatmul.mubr.msk.f32.gmra.mrb[2].mxu1 %vm66_vm1, %v43_v11  ;;  %308 = vmatprep.mubr.f32.mxu0 %v982_v0  ;;  %p958_p6 = pnand %p957_p5, %p951_p2 }
  0x31   :  { %385 = vmatprep.mubr.f32.mxu1 %v982_v0  ;;  %55 = vperm.xlu0 %852, %v45_v13  }
  0x32   :  { %416 = vperm.xlu1 %853, %v47_v14  }
  0x33   :  { %818 = vmatmul.mubr.msk.f32.vlgmr.msra.gmra.mrb[4].mxu0 %vm66_vm1, %v42_v8 }
  0x34   :  { %822 = vmatmul.mubr.msk.f32.vlgmr.msra.gmra.mrb[4].mxu1 %vm66_vm1, %v42_v8  ;;  %314 = vmatprep.mubr.f32.mxu0 %v982_v0 }
  0x35   :  { %391 = vmatprep.mubr.f32.mxu1 %v982_v0 }
  0x37   :  { %819 = vmatmul.mubr.msk.f32.gmra.mrb[6].mxu0 %vm66_vm1, %v43_v11 }
  0x38   :  { %823 = vmatmul.mubr.msk.f32.gmra.mrb[6].mxu1 %vm66_vm1, %v43_v11  ;;  %487 = vmatprep.mubr.f32.mxu0 %v982_v0 }
  0x39   :  { %558 = vmatprep.mubr.f32.mxu1 %v982_v0 }
  0xa8   :  { %v51_v15 = vpop.permute.xlu0 %50 }
  0xb0   :  { %v56_v22 = vpop.permute.xlu0 %55 }
  0xb1   :  { %v417_v11 = vpop.permute.xlu1 %416 }
  0xfe   :  { %v156_v16 = vpop.f32.mrb[0].mxu0 }
  0xff   :  { %v233_v17 = vpop.f32.mrb[0].mxu1  ;;  %v157_v18 = vadd.f32 %v156_v16, %v51_v15  ;;  %v158_v20 = vpop.f32.mrb[1].mxu0 }
 0x100   :  { %v234_v19 = vadd.f32 %v233_v17, %v51_v15  ;;  %v235_v21 = vpop.f32.mrb[1].mxu1  ;;  %v159_v23 = vadd.f32 %v158_v20, %v51_v15 }
 0x101   :  { %v236_v24 = vadd.f32 %v235_v21, %v51_v15  ;;  %858 = vtanh.f32 %v157_v18 }
 0x102   :  { %860 = vtanh.f32 %v234_v19  ;;  %v162_v25 = vpop.f32.mrb[2].mxu0 }
 0x103   :  { %v239_v26 = vpop.f32.mrb[2].mxu1  ;;  %862 = vtanh.f32 %v159_v23  ;;  %v163_v27 = vadd.f32 %v162_v25, %v56_v22  ;;  %v164_v29 = vpop.f32.mrb[3].mxu0 }
 0x104   :  { %v240_v28 = vadd.f32 %v239_v26, %v56_v22  ;;  %v241_v30 = vpop.f32.mrb[3].mxu1  ;;  %864 = vtanh.f32 %v236_v24  ;;  %v165_v31 = vadd.f32 %v164_v29, %v56_v22 }
 0x105   :  { %v242_v32 = vadd.f32 %v241_v30, %v56_v22  ;;  %866 = vtanh.f32 %v163_v27 }
 0x106   :  { %868 = vtanh.f32 %v240_v28  ;;  %v310_v33 = vpop.f32.mrb[4].mxu0 }
 0x107   :  { %v387_v34 = vpop.f32.mrb[4].mxu1  ;;  %870 = vtanh.f32 %v165_v31  ;;  %v311_v35 = vadd.f32 %v310_v33, %v51_v15  ;;  %v312_v37 = vpop.f32.mrb[5].mxu0  ;;  %v984_v31 = vmov 1983009808   ;;  %v752_v33 = vlaneseq }
 0x108   :  { %v388_v36 = vadd.f32 %v387_v34, %v51_v15  ;;  %v389_v38 = vpop.f32.mrb[5].mxu1  ;;  %872 = vtanh.f32 %v242_v32  ;;  %v313_v39 = vadd.f32 %v312_v37, %v51_v15  ;;  %v750_v32 = vunpack.c.l.s4 %v984_v31 }
 0x109   :  { %v390_v40 = vadd.f32 %v389_v38, %v51_v15  ;;  %874 = vtanh.f32 %v311_v35 }
 0x10a   :  { %876 = vtanh.f32 %v388_v36  ;;  %v316_v41 = vpop.f32.mrb[6].mxu0 }
 0x10b   :  { %v393_v42 = vpop.f32.mrb[6].mxu1  ;;  %v859_v43 = vpop.eup %858  ;;  %878 = vtanh.f32 %v313_v39  ;;  %v317_v44 = vadd.f32 %v316_v41, %v56_v22  ;;  %v751_v39 = vunpack.c.0.s8 %v750_v32 }
 0x10c   :  { %v394_v45 = vadd.f32 %v393_v42, %v56_v22  ;;  %v318_v46 = vpop.f32.mrb[7].mxu0  ;;  %v395_v47 = vpop.f32.mrb[7].mxu1  ;;  %880 = vtanh.f32 %v390_v40  ;;  %v753_v40 = vshrl.u32 %v752_v33, 7 }
 0x10d   :  { %v861_v48 = vpop.eup %860  ;;  %v319_v49 = vadd.f32 %v318_v46, %v56_v22  ;;  %v396_v50 = vadd.f32 %v395_v47, %v56_v22  ;;  %882 = vtanh.f32 %v317_v44 }
 0x10e   :  { %v863_v51 = vpop.eup %862  ;;  %884 = vtanh.f32 %v394_v45 }
 0x10f   :  { %v865_v52 = vpop.eup %864  ;;  %886 = vtanh.f32 %v319_v49 }
 0x110   :  { %v867_v53 = vpop.eup %866  ;;  %888 = vtanh.f32 %v396_v50  ;;  %v754_v50 = vsub.s32 %v751_v39, %v753_v40 }
 0x111   :  { %v869_v54 = vpop.eup %868  ;;  %v830_v55 = vpack.c.bf16 %v867_v53, %v859_v43 }
 0x112   :  { %v871_v56 = vpop.eup %870  ;;  %v834_v57 = vpack.c.bf16 %v869_v54, %v861_v48 }
 0x113   :  { %v873_v58 = vpop.eup %872  ;;  %v828_v59 = vpack.c.bf16 %v871_v56, %v863_v51 }
 0x114   :  { %v875_v60 = vpop.eup %874  ;;  %v832_v61 = vpack.c.bf16 %v873_v58, %v865_v52 }
 0x115   :  { %v877_v62 = vpop.eup %876  ;;  %829 = vmatprep.subr.bf16.mxu0 %v828_v59 }
 0x116   :  { %v879_v63 = vpop.eup %878  ;;  %833 = vmatprep.subr.bf16.mxu1 %v832_v61  ;;  %831 = vmatpush1.bf16.msra.mxu0 %v830_v55 }
 0x117   :  { %v881_v2 = vpop.eup %880  ;;  %835 = vmatpush1.bf16.msra.mxu1 %v834_v57 }
 0x118   :  { %v883_v3 = vpop.eup %882 }
 0x119   :  { %v885_v4 = vpop.eup %884  ;;  %824 = vmatmul.mubr.msk.f32.vlgmr.msra.gmra.mrb[8].mxu0 %vm419_vm2, %v46_v1  ;;  %v838_v5 = vpack.c.bf16 %v883_v3, %v875_v60 }
 0x11a   :  { %v887_v6 = vpop.eup %886  ;;  %825 = vmatmul.mubr.msk.f32.vlgmr.msra.gmra.mrb[8].mxu1 %vm419_vm2, %v46_v1  ;;  %v842_v7 = vpack.c.bf16 %v885_v4, %v877_v62  ;;  %629 = vmatprep.mubr.f32.mxu0 %v982_v0 }
 0x11b   :  { %v889_v8 = vpop.eup %888  ;;  %v836_v9 = vpack.c.bf16 %v887_v6, %v879_v63  ;;  %700 = vmatprep.mubr.f32.mxu1 %v982_v0 }
 0x11c   :  { %v840_v10 = vpack.c.bf16 %v889_v8, %v881_v2 }
 0x11d   :  { %837 = vmatprep.subr.bf16.mxu0 %v836_v9 }
 0x11e   :  { %841 = vmatprep.subr.bf16.mxu1 %v840_v10  ;;  %839 = vmatpush1.bf16.msra.mxu0 %v838_v5 }
 0x11f   :  { %843 = vmatpush1.bf16.msra.mxu1 %v842_v7 }
 0x121   :  { %826 = vmatmul.mubr.msk.f32.vlgmr.msra.gmra.mrb[10].mxu0 %vm419_vm2, %v46_v1 }
 0x122   :  { %827 = vmatmul.mubr.msk.f32.vlgmr.msra.gmra.mrb[10].mxu1 %vm419_vm2, %v46_v1 }
 0x1ec   :  { %v489_v12 = vpop.f32.mrb[8].mxu0 }
 0x1ed   :  { %v560_v13 = vpop.f32.mrb[8].mxu1  ;;  %v490_v14 = vadd.f32 %v489_v12, %v417_v11  ;;  %v491_v15 = vpop.f32.mrb[9].mxu0 }
 0x1ee   :  { %v492_v16 = vadd.f32 %v491_v15, %v417_v11  ;;  %v561_v17 = vadd.f32 %v560_v13, %v417_v11  ;;  %v562_v18 = vpop.f32.mrb[9].mxu1 }
 0x1ef   :  { %v707_v19 = vmul.f32 0.5, %v490_v14  ;;  %v563_v20 = vadd.f32 %v562_v18, %v417_v11 }
 0x1f0   :  { %v708_v0 = vmul.f32 0.5, %v492_v16  ;;  %v709_v21 = vmul.f32 0.5, %v561_v17 }
 0x1f1   :  { %890 = vtanh.f32 %v707_v19  ;;  %v710_v22 = vmul.f32 0.5, %v563_v20 }
 0x1f2   :  { %892 = vtanh.f32 %v708_v0 }
 0x1f3   :  { %894 = vtanh.f32 %v709_v21 }
 0x1f4   :  { %896 = vtanh.f32 %v710_v22  ;;  %v631_v23 = vpop.f32.mrb[10].mxu0 }
 0x1f5   :  { %v632_v24 = vadd.f32 %v631_v23, %v417_v11  ;;  %v702_v25 = vpop.f32.mrb[10].mxu1  ;;  %v633_v26 = vpop.f32.mrb[11].mxu0 }
 0x1f6   :  { %v703_v27 = vadd.f32 %v702_v25, %v417_v11  ;;  %v634_v28 = vadd.f32 %v633_v26, %v417_v11  ;;  %v704_v29 = vpop.f32.mrb[11].mxu1 }
 0x1f7   :  { %v711_v30 = vmul.f32 0.5, %v632_v24  ;;  %v705_v34 = vadd.f32 %v704_v29, %v417_v11 }
 0x1f8   :  { %v713_v35 = vmul.f32 0.5, %v703_v27  ;;  %v712_v36 = vmul.f32 0.5, %v634_v28 }
 0x1f9   :  { %898 = vtanh.f32 %v711_v30  ;;  %v714_v37 = vmul.f32 0.5, %v705_v34 }
 0x1fa   :  { %900 = vtanh.f32 %v713_v35 }
 0x1fb   :  { %v891_v38 = vpop.eup %890  ;;  %902 = vtanh.f32 %v712_v36 }
 0x1fc   :  { %v893_v41 = vpop.eup %892  ;;  %v723_v42 = vadd.f32 1.0, %v891_v38  ;;  %904 = vtanh.f32 %v714_v37 }
 0x1fd   :  { %v895_v43 = vpop.eup %894  ;;  %v724_v44 = vadd.f32 1.0, %v893_v41 }
 0x1fe   :  { %v897_v45 = vpop.eup %896  ;;  %v731_v46 = vmul.f32 0.5, %v723_v42  ;;  %v725_v47 = vadd.f32 1.0, %v895_v43 }
 0x1ff   :  { %v732_v48 = vmul.f32 0.5, %v724_v44  ;;  %v726_v49 = vadd.f32 1.0, %v897_v45 }
 0x200   :  { %v733_v51 = vmul.f32 0.5, %v725_v47 }
 0x201   :  { %v747_v52 = vcombine.low %v731_v46, %v732_v48  ;;  %v734_v53 = vmul.f32 0.5, %v726_v49 }
 0x203   :  { %v899_v54 = vpop.eup %898  ;;  %v748_v55 = vcombine.low %v733_v51, %v734_v53  ;;  %v755_v56 = vrot.slane %v747_v52, %v754_v50 }
 0x204   :  { %v901_v57 = vpop.eup %900  ;;  %v727_v58 = vadd.f32 1.0, %v899_v54 }
 0x205   :  { %v903_v59 = vpop.eup %902  ;;  %v729_v60 = vadd.f32 1.0, %v901_v57  ;;  %v762_v61 = vrot.slane %v748_v55, %v754_v50 }
 0x206   :  { %v905_v62 = vpop.eup %904  ;;  %v735_v63 = vmul.f32 0.5, %v727_v58  ;;  %v728_v1 = vadd.f32 1.0, %v903_v59 }
 0x207   :  { %v737_v2 = vmul.f32 0.5, %v729_v60  ;;  %v730_v3 = vadd.f32 1.0, %v905_v62  ;;  %v763_v4 = vcombine.low %v755_v56, %v762_v61 }
 0x208   :  { %v736_v5 = vmul.f32 0.5, %v728_v1 }
 0x209   :  { %v738_v6 = vmul.f32 0.5, %v730_v3  ;;  %783 = vst [vmem:[#allocation7] sm:$0xff] %v763_v4 }
 0x20a   :  { %v764_v7 = vcombine.low %v735_v63, %v736_v5 }
 0x20b   :  { %v765_v8 = vcombine.low %v737_v2, %v738_v6 }
 0x20c   :  { %v772_v9 = vrot.slane %v764_v7, %v754_v50 }
 0x20d   :  { %v779_v10 = vrot.slane %v765_v8, %v754_v50 }
 0x20f   :  { %v780_v11 = vcombine.low %v772_v9, %v779_v10 }
 0x211   :  { %791 = vst.msk [vmem:[#allocation7 + $0x8] sm:$0xff] %vm790_vm9, %v780_v11 }
 0x212   :  { %961 = shalt.err (!%p958_p6)
}
 0x213   :  { %s962_s10 = scalar_lea.hbm %s1078_s2, 256 }
 0x214   :  { %p963_p7 = scmp.ne.s32.totalorder %s1078_s2, %s962_s10  ;;  %p966_p8 = scmp.lt.u32.totalorder %s962_s10, %s1078_s2 }
 0x216   :  { %p968_p9 = pnand %p966_p8, %p963_p7 }
 0x218   :  { %971 = shalt.err (!%p968_p9)
}
 0x219   :  { %801 = dma.vmem_to_hbm [thread:$0]  %s799_s6, 256, %s1078_s2, [#allocation4]  }
 0x21a   :  { %976 = dma.done.wait [#allocation4], 256  }
 0x21b   :  { %977 = vsyncadd [#allocation4], 4294967040 }
 0x21c   :  { %805 = vsyncpa [#allocation3], 1 }
 0x21d   :  { %806 = vsyncpa [#allocation6], 1 }
 0x21e   :  { %807 = vsyncpa [#allocation4], 1 }

</bundles_post_ra>
